<compile_context>
chip_gen: v7x
topology: tpu7x:2x2x1
jax: 0.10.0
libtpu: 0.0.40
codegen_flags: <defaults>
</compile_context>

<pallas_src>
import functools
import random

import numpy as np
import jax
import jax.numpy as jnp
from jax.experimental import pallas as pl
from jax.experimental.pallas import tpu as pltpu


N_PRED = 192            # predictions per image
N_GT = 4                # ground-truth lanes per image
B_PAIRS = 18            # default b in forward()
IMG_W = 800.0           # cfg.img_w
POS_DIST_THRESH = 0.99  # cfg.matchnet_pos_dist_thresh (on normalized distances)

_VMEM = pl.BlockSpec(memory_space=pltpu.MemorySpace.VMEM)


# --------------------------------------------------------------------------- #
# Single fused kernel: flat one-hot gather + theta/xy/dist normalization +
# pair_match, merged output.
#   stacked_ref: [8, N_PRED*N_GT] f32, rows = (theta_raw, xys_raw, dist_raw,
#                pos_score, neg_score, iou, 0, 0)   -- lane-dense RHS
#   sel_ref:     [b_pad, 2] int32, col0 = flat_idx (pred*N_GT + gt), col1 = is_pos
#   out_ref:     [b_pad, 8] f32, cols 0..5 = pair_features, col 6 = pair_match,
#                col 7 = pad
# Padded pair rows (flat_idx=0, is_pos=0) gather map element 0; this is only
# safe because the caller slices outputs to [:n].
# --------------------------------------------------------------------------- #
def _pairs_kernel(stacked_ref, sel_ref, out_ref, *, img_w, pos_dist_thresh):
    b_pad = sel_ref.shape[0]
    n_flat = stacked_ref.shape[1]

    sel = sel_ref[...]                                   # [b_pad, 2] int32
    flat_idx = sel[:, 0:1]                               # [b_pad, 1]
    is_pos = sel[:, 1:2].astype(jnp.float32)             # [b_pad, 1]

    # Flat one-hot selector; one MXU matmul gathers all six features at once.
    iota = jax.lax.broadcasted_iota(jnp.int32, (b_pad, n_flat), 1)
    onehot = (iota == flat_idx).astype(jnp.float32)      # [b_pad, n_flat]

    # Contract the 768 axis of both operands (onehot @ stacked.T).  HIGHEST
    # precision keeps the gathered raw values exact enough for the >= 0.99
    # pair_match comparison and the reference check.
    raw = jax.lax.dot_general(
        onehot, stacked_ref[...],
        dimension_numbers=(((1,), (1,)), ((), ())),
        preferred_element_type=jnp.float32,
        precision=jax.lax.Precision.HIGHEST)             # [b_pad, 8]

    # Normalize theta (col 0), start_xy (col 1) and dist (col 2) on the gathered
    # values only (one-sided clamp, faithful to the original norm()).
    col = jax.lax.broadcasted_iota(jnp.int32, raw.shape, 1)
    theta_n = 1.0 - jnp.minimum(raw, 180.0) / 180.0
    w_n = 1.0 - jnp.minimum(raw, img_w) / img_w
    feat = jnp.where(col == 0, theta_n,
                     jnp.where((col == 1) | (col == 2), w_n, raw))

    # pair_match: 1 for positives, 0 for negatives; positives whose normalized
    # distance < pos_dist_thresh are zeroed (the `mask` loop in forward()).
    dist_n = feat[:, 2:3]
    match = is_pos * (dist_n >= pos_dist_thresh).astype(jnp.float32)

    # Cols 6,7 of `feat` are already 0 (zero pad rows of stacked); overwrite
    # col 6 with pair_match.  Single full-tile store.
    out_ref[...] = jnp.where(col == 6, match, feat)


@functools.partial(jax.jit, static_argnames=("img_w", "pos_dist_thresh"))
def _device_forward(theta, xys, dist, pos_s, neg_s, iou, sel_packed,
                    *, img_w, pos_dist_thresh):
    # Layout plumbing fused into the same jitted executable as the kernel.
    stacked6 = jnp.stack(
        [theta.reshape(-1), xys.reshape(-1), dist.reshape(-1),
         pos_s.reshape(-1), neg_s.reshape(-1), iou.reshape(-1)],
        axis=0).astype(jnp.float32)                      # [6, n_flat] lane-dense
    stacked = jnp.pad(stacked6, ((0, 2), (0, 0)))        # [8, n_flat]

    b_pad = sel_packed.shape[0]
    return pl.pallas_call(
        functools.partial(_pairs_kernel, img_w=float(img_w),
                          pos_dist_thresh=float(pos_dist_thresh)),
        out_shape=jax.ShapeDtypeStruct((b_pad, 8), jnp.float32),
        in_specs=[_VMEM, _VMEM],
        out_specs=_VMEM,
    )(stacked, sel_packed)


def gather_pair_features(theta, xys, dist, pos_s, neg_s, iou,
                         sel_pred, sel_gt, is_pos, img_w, pos_dist_thresh):
    n_gt = theta.shape[1]
    n = int(np.asarray(sel_pred).shape[0])
    b_pad = max(8, ((n + 7) // 8) * 8)                   # pad pairs to sublane multiple

    # Pack (flat_idx, is_pos) into one small int32 block on the host.
    sel_packed = np.zeros((b_pad, 2), np.int32)
    sel_packed[:n, 0] = (np.asarray(sel_pred, np.int32) * n_gt
                         + np.asarray(sel_gt, np.int32))
    sel_packed[:n, 1] = (np.asarray(is_pos, np.float32) > 0.5)

    out = _device_forward(theta, xys, dist, pos_s, neg_s, iou,
                          jnp.asarray(sel_packed),
                          img_w=float(img_w),
                          pos_dist_thresh=float(pos_dist_thresh))
    return out[:n, :6], out[:n, 6:7]


# --------------------------------------------------------------------------- #
# Host-side glue: positive/negative pair selection + shuffle (seeded RNG).
# --------------------------------------------------------------------------- #
# TODO(synk): random.shuffle + variable-length filtering of negative candidates
# is host/data-dependent and has no clean Pallas equivalent; reproduced on host
# (including the original's neg-gt indexing quirk).  The only D2H transfer is
# the raw `dist` input, normalized in NumPy for the >0.3 candidate filter.
def select_pairs(dist_norm_np, matched_row_inds, matched_col_inds, b, seed=0):
    rng = random.Random(seed)

    # select_positive_matches
    pos_pred = [int(v) for v in list(matched_row_inds)][:b]
    pos_gt = [int(v) for v in list(matched_col_inds)][:b]

    # select_negative_matches (faithful, incl. the index quirk: shuffled indices
    # over the *filtered* pred list index the *unfiltered* gt list)
    neg_match_num = int(np.maximum(b - matched_row_inds.shape[0], 0))
    neg_pred_all, neg_gt_all = np.where(dist_norm_np > 0.3)
    matched_set = set(int(v) for v in matched_row_inds)
    neg_pred = [int(p) for p in neg_pred_all if int(p) not in matched_set]
    indices = list(range(len(neg_pred)))
    rng.shuffle(indices)
    neg_pred_ind = [neg_pred[i] for i in indices][:neg_match_num]
    neg_gt_ind = [int(neg_gt_all[i]) for i in indices][:neg_match_num]

    sel_pred = pos_pred + neg_pred_ind
    sel_gt = pos_gt + neg_gt_ind
    is_pos = [1.0] * len(pos_pred) + [0.0] * len(neg_pred_ind)

    # shuffle() — the positive-distance masking is per-pair, so applying the
    # permutation before the gather kernel is equivalent.
    perm = list(range(len(sel_pred)))
    rng.shuffle(perm)
    sel_pred = np.array([sel_pred[i] for i in perm], np.int32)
    sel_gt = np.array([sel_gt[i] for i in perm], np.int32)
    is_pos = np.array([is_pos[i] for i in perm], np.float32)
    return sel_pred, sel_gt, is_pos


def generate_pairs_forward(theta, xys, dist, pos_s, neg_s, iou,
                           matched_row_inds, matched_col_inds,
                           b=B_PAIRS, img_w=IMG_W,
                           pos_dist_thresh=POS_DIST_THRESH, seed=0):
    # 1) Host needs the normalized distance map only for negative-candidate
    #    selection; `dist` is a raw INPUT (no device kernel precedes it), so the
    #    D2H copy is off any kernel critical path, and 768 floats are normalized
    #    in NumPy instead of launching a device kernel for it.
    dist_np = np.asarray(jax.device_get(dist), np.float32)
    dist_norm_np = 1.0 - np.minimum(dist_np, float(img_w)) / float(img_w)

    # 2) data-dependent pair selection on host (glue; seeded RNG).
    sel_pred, sel_gt, is_pos = select_pairs(
        dist_norm_np, np.asarray(matched_row_inds), np.asarray(matched_col_inds),
        b, seed=seed)

    # 3) single fused device kernel: gather + normalization + pair_match.
    pair_features, pair_match = gather_pair_features(
        theta, xys, dist, pos_s, neg_s, iou,
        sel_pred, sel_gt, is_pos, img_w, pos_dist_thresh)

    sel_gt_out = jnp.asarray(sel_gt, jnp.int32)[:, None]
    sel_pred_out = jnp.asarray(sel_pred, jnp.int32)
    return pair_features, sel_gt_out, pair_match, sel_pred_out


if __name__ == "__main__":
    key = jax.random.PRNGKey(0)
    ks = jax.random.split(key, 6)
    theta = jax.random.uniform(ks[0], (N_PRED, N_GT), jnp.float32, 0.0, 220.0)
    xys = jax.random.uniform(ks[1], (N_PRED, N_GT), jnp.float32, 0.0, 900.0)
    dist = jax.random.uniform(ks[2], (N_PRED, N_GT), jnp.float32, 0.0, 900.0)
    pos_s = jax.random.uniform(ks[3], (N_PRED, N_GT), jnp.float32)
    neg_s = jax.random.uniform(ks[4], (N_PRED, N_GT), jnp.float32)
    iou = jax.random.uniform(ks[5], (N_PRED, N_GT), jnp.float32)

    # matched (positive) gt-pred pairs from the "classic cost function"
    matched_row_inds = np.array([5, 42, 100], np.int32)   # prediction indices
    matched_col_inds = np.array([0, 1, 2], np.int32)      # gt indices

    pair_features, sel_gt_ind, pair_match, sel_pred_ind = generate_pairs_forward(
        theta, xys, dist, pos_s, neg_s, iou,
        matched_row_inds, matched_col_inds,
        b=B_PAIRS, img_w=IMG_W, pos_dist_thresh=POS_DIST_THRESH, seed=0)

    jax.block_until_ready(pair_features)
    jax.block_until_ready(pair_match)

    n_pairs = int(sel_pred_ind.shape[0])
    assert n_pairs == B_PAIRS
    assert pair_features.shape == (n_pairs, 6)
    assert sel_gt_ind.shape == (n_pairs, 1)
    assert pair_match.shape == (n_pairs, 1)
    assert bool(jnp.all(jnp.isfinite(pair_features)))
    assert bool(jnp.all((pair_match == 0.0) | (pair_match == 1.0)))

    # Full reference check against a NumPy implementation of the gather + norm.
    theta_np = np.asarray(theta); xys_np = np.asarray(xys)
    dist_np = np.asarray(dist); pos_np = np.asarray(pos_s)
    neg_np = np.asarray(neg_s); iou_np = np.asarray(iou)
    theta_n = 1.0 - np.minimum(theta_np, 180.0) / 180.0
    xys_n = 1.0 - np.minimum(xys_np, IMG_W) / IMG_W
    dist_n = 1.0 - np.minimum(dist_np, IMG_W) / IMG_W

    sp = np.asarray(sel_pred_ind); sg = np.asarray(sel_gt_ind)[:, 0]
    feat_ref = np.stack([theta_n[sp, sg], xys_n[sp, sg], dist_n[sp, sg],
                         pos_np[sp, sg], neg_np[sp, sg], iou_np[sp, sg]], axis=1)
    is_pos_ref = np.isin(sp, matched_row_inds).astype(np.float32)
    match_ref = is_pos_ref * (dist_n[sp, sg] >= POS_DIST_THRESH).astype(np.float32)

    feat_np = np.asarray(pair_features)
    match_np = np.asarray(pair_match)[:, 0]
    assert np.allclose(feat_np, feat_ref, atol=1e-4, rtol=1e-4), \
        np.max(np.abs(feat_np - feat_ref))
    # Exact match check except for pairs numerically on the threshold.
    near = np.abs(dist_n[sp, sg] - POS_DIST_THRESH) < 1e-5
    assert np.all((match_np == match_ref) | near)

    print("KERNEL_OK")
</pallas_src>

<mosaic_0001>
module attributes {stable_mosaic.version = 11 : i64} {
  func.func @_pairs_kernel(%arg0: memref<8x768xf32, #tpu.memory_space<vmem>>, %arg1: memref<24x2xi32, #tpu.memory_space<vmem>>, %arg2: memref<24x8xf32, #tpu.memory_space<vmem>>) attributes {dimension_semantics = [], scalar_prefetch = 0 : i64, scratch_operands = 0 : i64, tpu.core_type = #tpu.core_type<tc>} {
    %c0 = arith.constant 0 : index
    %c0_0 = arith.constant 0 : index
    %0 = vector.load %arg1[%c0, %c0_0] : memref<24x2xi32, #tpu.memory_space<vmem>>, vector<24x2xi32>
    %1 = vector.extract_strided_slice %0 {offsets = [0, 0], sizes = [24, 1], strides = [1, 1]} : vector<24x2xi32> to vector<24x1xi32>
    %2 = vector.extract_strided_slice %0 {offsets = [0, 1], sizes = [24, 1], strides = [1, 1]} : vector<24x2xi32> to vector<24x1xi32>
    %3 = arith.sitofp %2 : vector<24x1xi32> to vector<24x1xf32>
    %4 = tpu.iota {dimensions = array<i32: 1>} : vector<24x768xi32>
    %5 = vector.broadcast %1 : vector<24x1xi32> to vector<24x768xi32>
    %6 = arith.cmpi eq, %4, %5 : vector<24x768xi32>
    %7 = arith.extui %6 : vector<24x768xi1> to vector<24x768xi32>
    %8 = arith.sitofp %7 : vector<24x768xi32> to vector<24x768xf32>
    %c0_1 = arith.constant 0 : index
    %c0_2 = arith.constant 0 : index
    %9 = vector.load %arg0[%c0_1, %c0_2] : memref<8x768xf32, #tpu.memory_space<vmem>>, vector<8x768xf32>
    %cst = arith.constant dense<0.000000e+00> : vector<24x8xf32>
    %10 = tpu.matmul %8, %9, %cst {dimension_numbers = #tpu.dot_dimension_numbers<[1], [1], [0], [0], [0, 0, 1, 0], [], []>, precision = #tpu.contract_precision<fp32>} : vector<24x768xf32>, vector<8x768xf32>, vector<24x8xf32> -> vector<24x8xf32>
    %11 = tpu.iota {dimensions = array<i32: 1>} : vector<24x8xi32>
    %cst_3 = arith.constant 1.800000e+02 : f32
    %12 = vector.broadcast %cst_3 : f32 to vector<24x8xf32>
    %13 = arith.minimumf %10, %12 : vector<24x8xf32>
    %cst_4 = arith.constant 1.800000e+02 : f32
    %14 = vector.broadcast %cst_4 : f32 to vector<24x8xf32>
    %15 = arith.divf %13, %14 : vector<24x8xf32>
    %cst_5 = arith.constant 1.000000e+00 : f32
    %16 = vector.broadcast %cst_5 : f32 to vector<24x8xf32>
    %17 = arith.subf %16, %15 : vector<24x8xf32>
    %cst_6 = arith.constant 8.000000e+02 : f32
    %18 = vector.broadcast %cst_6 : f32 to vector<24x8xf32>
    %19 = arith.minimumf %10, %18 : vector<24x8xf32>
    %cst_7 = arith.constant 8.000000e+02 : f32
    %20 = vector.broadcast %cst_7 : f32 to vector<24x8xf32>
    %21 = arith.divf %19, %20 : vector<24x8xf32>
    %cst_8 = arith.constant 1.000000e+00 : f32
    %22 = vector.broadcast %cst_8 : f32 to vector<24x8xf32>
    %23 = arith.subf %22, %21 : vector<24x8xf32>
    %c0_i32 = arith.constant 0 : i32
    %24 = vector.broadcast %c0_i32 : i32 to vector<24x8xi32>
    %25 = arith.cmpi eq, %11, %24 : vector<24x8xi32>
    %c1_i32 = arith.constant 1 : i32
    %26 = vector.broadcast %c1_i32 : i32 to vector<24x8xi32>
    %27 = arith.cmpi eq, %11, %26 : vector<24x8xi32>
    %c2_i32 = arith.constant 2 : i32
    %28 = vector.broadcast %c2_i32 : i32 to vector<24x8xi32>
    %29 = arith.cmpi eq, %11, %28 : vector<24x8xi32>
    %30 = arith.ori %27, %29 : vector<24x8xi1>
    %31 = arith.select %30, %23, %10 : vector<24x8xi1>, vector<24x8xf32>
    %32 = arith.select %25, %17, %31 : vector<24x8xi1>, vector<24x8xf32>
    %33 = vector.extract_strided_slice %32 {offsets = [0, 2], sizes = [24, 1], strides = [1, 1]} : vector<24x8xf32> to vector<24x1xf32>
    %cst_9 = arith.constant 9.900000e-01 : f32
    %34 = vector.broadcast %cst_9 : f32 to vector<24x1xf32>
    %35 = arith.cmpf oge, %33, %34 : vector<24x1xf32>
    %36 = arith.extui %35 : vector<24x1xi1> to vector<24x1xi32>
    %37 = arith.sitofp %36 : vector<24x1xi32> to vector<24x1xf32>
    %38 = arith.mulf %3, %37 : vector<24x1xf32>
    %c6_i32 = arith.constant 6 : i32
    %39 = vector.broadcast %c6_i32 : i32 to vector<24x8xi32>
    %40 = arith.cmpi eq, %11, %39 : vector<24x8xi32>
    %41 = vector.shape_cast %38 : vector<24x1xf32> to vector<24x1xf32>
    %42 = vector.broadcast %41 : vector<24x1xf32> to vector<24x8xf32>
    %43 = arith.select %40, %42, %32 : vector<24x8xi1>, vector<24x8xf32>
    %c0_10 = arith.constant 0 : index
    %c0_11 = arith.constant 0 : index
    %44 = vector.load %arg2[%c0_10, %c0_11] : memref<24x8xf32, #tpu.memory_space<vmem>>, vector<24x8xf32>
    tpu.vector_store %arg2[%c0_10, %c0_11], %43 {strides = array<i32>} : memref<24x8xf32, #tpu.memory_space<vmem>>, vector<24x8xf32>,
    return
  }
}

</mosaic_0001>

<bundles_post_ra>
// kernel: _device_forward.1
= control target key start
LH: loop header
LB: loop body
LE: loop exit
PB: predicated region body
PF: predicated region fallthrough
CT: control target
= control target key end

     0   :  { %v2114_v0 = vmov 0   ;;  %v17_v18 = vlaneseq  ;;  %v2817_v31 = vmov 0.0   ;;  %s2807_s1 = inlined_call_operand.vmem [shape: s32[24,2], index: 1, kind: input, shape index: {}]   ;;  %s2808_s0 = inlined_call_operand.vmem [shape: f32[8,768], index: 0, kind: input, shape index: {}]   ;;  %s2809_s2 = inlined_call_operand.vmem [shape: f32[24,8], index: 2, kind: output, shape index: {}]  }
   0x1   :  { %2105 = vset.pattern.permute.xlu0 %v2114_v0  ;;  %v2137_v1 = vld [vmem:[%s2807_s1] sm:$0xff]  ;;  %2106 = vset.pattern.permute.xlu1 %v2114_v0  ;;  %v2142_v2 = vld [vmem:[%s2807_s1 + $0x10] sm:$0xff]  ;;  %v2149_v3 = vld [vmem:[%s2807_s1 + $0x8] sm:$0xff] }
   0x2   :  { %25 = vperm.xlu0 %2105, %v2137_v1   ;;  %31 = vperm.xlu1 %2106, %v2142_v2   ;;  %v90_v4 = vld [vmem:[%s2808_s0 + $0x18] sm:$0xff]  ;;  %v89_v5 = vld [vmem:[%s2808_s0 + $0x10] sm:$0xff]  ;;  %v88_v8 = vld [vmem:[%s2808_s0 + $0x8] sm:$0xff]  ;;  %v2189_v19 = vand.u32 127, %v17_v18 }
   0x3   :  { %v2157_v6 = vand.u32 4294901760, %v90_v4  ;;  %v2159_v7 = vand.u32 4294901760, %v89_v5  ;;  %v2167_v9 = vand.u32 4294901760, %v88_v8  ;;  %v87_v10 = vld [vmem:[%s2808_s0] sm:$0xff] }
   0x4   :  { %v2173_v11 = vand.u32 4294901760, %v87_v10  ;;  %v2195_v21 = vadd.s32 256, %v2189_v19  ;;  %v2204_v25 = vadd.s32 128, %v2189_v19  ;;  %v2207_v26 = vadd.s32 384, %v2189_v19 }
   0x5   :  { %982 = vmatprep.subr.mxu0 %v2157_v6  ;;  %94 = vmatprep.subr.mxu1 %v2167_v9  ;;  %v2177_v12 = vsub.f32 %v88_v8, %v2167_v9  ;;  %v2180_v13 = vsub.f32 %v90_v4, %v2157_v6  ;;  %v2198_v22 = vsub.f32 %v89_v5, %v2159_v7 }
   0x6   :  { %28 = vperm.xlu0 %2105, %v2149_v3   ;;  %984 = vmatpush1.xpose.msra.mxu0 %v2159_v7  ;;  %v2192_v20 = vsub.f32 %v87_v10, %v2173_v11 }
   0x7   :  { %96 = vmatpush1.xpose.msra.mxu1 %v2173_v11  ;;  %v207_v14 = vand.u32 4294901760, %v2177_v12  ;;  %v791_v15 = vand.u32 4294901760, %v2180_v13  ;;  %v2819_v29 = vand.u32 4294901760, %v2198_v22 }
   0x8   :  { %v213_v23 = vand.u32 4294901760, %v2192_v20 }
   0x9   :  { %v208_v16 = vsub.f32 %v2177_v12, %v207_v14  ;;  %1084 = vmatprep.subr.mxu0 %v791_v15 }
   0xa   :  { %v2218_v28 = vsub.f32 %v2192_v20, %v213_v23 }
   0xb   :  { %v209_v17 = vand.u32 4294901760, %v208_v16 }
   0xc   :  { %v215_v62 = vand.u32 4294901760, %v2218_v28 }
   0xd   :  { %210 = vmatprep.subr.mxu1 %v209_v17 }
  0x81   :  { %v2201_v24 = vpop.permute.xlu0 %25  ;;  %v2213_v27 = vpop.permute.xlu1 %31 }
  0x82   :  { %vm33_vm0 = vcmp.eq.s32.totalorder %v2189_v19, %v2201_v24  ;;  %vm35_vm1 = vcmp.eq.s32.totalorder %v2195_v21, %v2201_v24  ;;  %vm2811_vm2 = vcmp.eq.s32.totalorder %v2207_v26, %v2201_v24  ;;  %vm34_vm3 = vcmp.eq.s32.totalorder %v2204_v25, %v2201_v24 }
  0x83   :  { %v1928_v32 = vsel %vm35_vm1, 1.0, %v2817_v31  ;;  %v1926_v33 = vsel %vm33_vm0, 1.0, %v2817_v31  ;;  %vm46_vm6 = vcmp.eq.s32.totalorder %v2204_v25, %v2213_v27  ;;  %vm2826_vm7 = vcmp.eq.s32.totalorder %v2195_v21, %v2213_v27 }
  0x84   :  { %vm48_vm9 = vcmp.eq.s32.totalorder %v2207_v26, %v2213_v27  ;;  %v1929_v34 = vsel %vm2811_vm2, 1.0, %v2817_v31  ;;  %v2251_v35 = vsub.f32 %v1928_v32, %v1928_v32  ;;  %v1927_v37 = vsel %vm34_vm3, 1.0, %v2817_v31  ;;  %v92_v32 = vld [vmem:[%s2808_s0 + $0x28] sm:$0xff] }
  0x85   :  { %v2221_v30 = vpop.permute.xlu0 %28  ;;  %v2253_v36 = vsub.f32 %v1929_v34, %v1929_v34  ;;  %v2263_v39 = vsub.f32 %v1926_v33, %v1926_v33  ;;  %v2266_v41 = vsub.f32 %v1927_v37, %v1927_v37  ;;  %vm45_vm11 = vcmp.eq.s32.totalorder %v2189_v19, %v2213_v27 }
  0x86   :  { %vm41_vm4 = vcmp.eq.s32.totalorder %v2195_v21, %v2221_v30  ;;  %vm42_vm5 = vcmp.eq.s32.totalorder %v2207_v26, %v2221_v30  ;;  %vm2810_vm8 = vcmp.eq.s32.totalorder %v2204_v25, %v2221_v30  ;;  %v2816_v40 = vand.u32 4294901760, %v2251_v35 }
  0x87   :  { %v1935_v38 = vsel %vm42_vm5, 1.0, %v2817_v31  ;;  %v1934_v43 = vsel %vm41_vm4, 1.0, %v2817_v31  ;;  %v2824_v44 = vand.u32 4294901760, %v2253_v36  ;;  %v167_v45 = vand.u32 4294901760, %v2263_v39 }
  0x88   :  { %v2268_v42 = vsub.f32 %v1935_v38, %v1935_v38  ;;  %v2276_v46 = vsub.f32 %v1934_v43, %v1934_v43  ;;  %v1933_v47 = vsel %vm2810_vm8, 1.0, %v2817_v31  ;;  %vm39_vm10 = vcmp.eq.s32.totalorder %v2189_v19, %v2221_v30 }
  0x89   :  { %v161_v48 = vand.u32 4294901760, %v2266_v41  ;;  %v2286_v50 = vsub.f32 %v1933_v47, %v1933_v47  ;;  %1050 = vmatprep.mubr.f32.mxu0 %v2824_v44  ;;  %v168_v51 = vsub.f32 %v2263_v39, %v167_v45  ;;  %v1941_v52 = vsel %vm48_vm9, 1.0, %v2817_v31 }
  0x8a   :  { %v2815_v49 = vand.u32 4294901760, %v2268_v42  ;;  %1054 = vmatmul.mubr.f32.vlgmr.msra.gmra.mrb[0].mxu0 %v2816_v40  ;;  %v2814_v54 = vand.u32 4294901760, %v2276_v46  ;;  %v2306_v56 = vsub.f32 %v1941_v52, %v1941_v52  ;;  %v1932_v58 = vsel %vm39_vm10, 1.0, %v2817_v31 }
  0x8b   :  { %v162_v53 = vsub.f32 %v2266_v41, %v161_v48  ;;  %v176_v55 = vand.u32 4294901760, %v2286_v50  ;;  %v169_v57 = vand.u32 4294901760, %v168_v51  ;;  %1088 = vmatpush1.xpose.msra.mxu0 %v2819_v29  ;;  %v1940_v59 = vsel %vm2826_vm7, 1.0, %v2817_v31 }
  0x8c   :  { %1061 = vmatprep.mubr.f32.mxu0 %v2815_v49  ;;  %v1939_v60 = vsel %vm46_vm6, 1.0, %v2817_v31  ;;  %v2328_v0 = vsub.f32 %v1932_v58, %v1932_v58  ;;  %1174 = vmatprep.subr.mxu0 %v2157_v6  ;;  %v2813_v4 = vand.u32 4294901760, %v2306_v56  ;;  %v2332_v5 = vsub.f32 %v1940_v59, %v1940_v59 }
  0x8d   :  { %v163_v61 = vand.u32 4294901760, %v162_v53  ;;  %v177_v63 = vsub.f32 %v2286_v50, %v176_v55  ;;  %v2334_v8 = vsub.f32 %v1939_v60, %v1939_v60  ;;  %v1938_v10 = vsel %vm45_vm11, 1.0, %v2817_v31 }
  0x8e   :  { %1065 = vmatmul.mubr.f32.gmra.mrb[2].mxu0 %v2814_v54  ;;  %v182_v17 = vand.u32 4294901760, %v2328_v0  ;;  %v2343_v18 = vsub.f32 %v1938_v10, %v1938_v10  ;;  %v2812_v34 = vand.u32 4294901760, %v2332_v5  ;;  %v2365_v51 = vand.u32 4294901760, %v92_v32 }
  0x8f   :  { %164 = vmatprep.mubr.f32.mxu1 %v163_v61  ;;  %v178_v16 = vand.u32 4294901760, %v177_v63  ;;  %1072 = vmatprep.mubr.f32.mxu0 %v2813_v4  ;;  %v191_v28 = vand.u32 4294901760, %v2334_v8  ;;  %v2368_v52 = vadd.s32 640, %v2189_v19  ;;  %v2378_v59 = vadd.s32 512, %v2189_v19 }
  0x90   :  { %170 = vmatmul.mubr.f32.vlgmr.msra.gmra.mrb[0].mxu1 %v169_v57  ;;  %v183_v33 = vsub.f32 %v2328_v0, %v182_v17  ;;  %v197_v37 = vand.u32 4294901760, %v2343_v18  ;;  %v2116_v57 = vmov 1.0   ;;  %v2375_v58 = vsub.f32 %v92_v32, %v2365_v51 }
  0x91   :  { %216 = vmatpush1.xpose.msra.mxu1 %v215_v62  ;;  %179 = vmatprep.mubr.f32.mxu1 %v178_v16  ;;  %v192_v38 = vsub.f32 %v2334_v8, %v191_v28  ;;  %vm38_vm12 = vcmp.eq.s32.totalorder %v2368_v52, %v2201_v24  ;;  %vm37_vm13 = vcmp.eq.s32.totalorder %v2378_v59, %v2201_v24  ;;  %v91_v62 = vld [vmem:[%s2808_s0 + $0x20] sm:$0xff]  ;;  %s2118_s0 = smov 127  }
  0x92   :  { %303 = vmatprep.subr.mxu1 %v2177_v12  ;;  %v184_v43 = vand.u32 4294901760, %v183_v33  ;;  %1076 = vmatmul.mubr.f32.gmra.mrb[4].mxu0 %v2812_v34  ;;  %v198_v47 = vsub.f32 %v2343_v18, %v197_v37  ;;  %v2825_v61 = vand.u32 4294901760, %v2375_v58  ;;  %v1931_v63 = vsel %vm38_vm12, 1.0, %v2817_v31 }
  0x93   :  { %v193_v53 = vand.u32 4294901760, %v192_v38  ;;  %1968 = vmatprep.mubr.msk.f32.mxu0 %vm2811_vm2, %v2116_v57  ;;  %vm44_vm14 = vcmp.eq.s32.totalorder %v2368_v52, %v2221_v30  ;;  %v1930_v16 = vsel %vm37_vm13, 1.0, %v2817_v31  ;;  %v2432_v32 = vand.u32 4294901760, %v91_v62 }
  0x94   :  { %185 = vmatmul.mubr.f32.gmra.mrb[2].mxu1 %v184_v43  ;;  %v199_v60 = vand.u32 4294901760, %v198_v47  ;;  %v1376_v10 = vsub.f32 %v2375_v58, %v2825_v61  ;;  %v2434_v33 = vsub.f32 %v1931_v63, %v1931_v63  ;;  %vm43_vm15 = vcmp.eq.s32.totalorder %v2378_v59, %v2221_v30 }
  0x95   :  { %194 = vmatprep.mubr.f32.mxu1 %v193_v53  ;;  %v1937_v38 = vsel %vm44_vm14, 1.0, %v2817_v31  ;;  %v2454_v43 = vsub.f32 %v91_v62, %v2432_v32  ;;  %v2456_v47 = vsub.f32 %v1930_v16, %v1930_v16  ;;  %v1936_v62 = vsel %vm43_vm15, 1.0, %v2817_v31 }
  0x96   :  { %1969 = vmatmul.mubr.msk.f32.vlgmr.msra.gmra.mrb[0].mxu0 %vm35_vm1, %v2116_v57  ;;  %v1377_v53 = vand.u32 4294901760, %v1376_v10  ;;  %v2467_v63 = vsub.f32 %v1937_v38, %v1937_v38  ;;  %v2494_v34 = vsub.f32 %v1936_v62, %v1936_v62 }
  0x97   :  { %1970 = vmatprep.mubr.msk.f32.mxu0 %vm42_vm5, %v2116_v57  ;;  %1176 = vmatpush1.xpose.msra.mxu0 %v2159_v7  ;;  %v2821_v16 = vand.u32 4294901760, %v2454_v43  ;;  %v2822_v38 = vand.u32 4294901760, %v2456_v47 }
  0x98   :  { %200 = vmatmul.mubr.f32.gmra.mrb[4].mxu1 %v199_v60  ;;  %1262 = vmatprep.subr.mxu0 %v2365_v51  ;;  %v2820_v60 = vand.u32 4294901760, %v2434_v33  ;;  %v2823_v54 = vand.u32 4294901760, %v2467_v63 }
  0x99   :  { %1944 = vmatprep.mubr.msk.f32.mxu1 %vm34_vm3, %v2116_v57  ;;  %v1336_v62 = vsub.f32 %v2456_v47, %v2822_v38 }
  0x9a   :  { %1971 = vmatmul.mubr.msk.f32.gmra.mrb[2].mxu0 %vm41_vm4, %v2116_v57  ;;  %v1330_v4 = vsub.f32 %v2434_v33, %v2820_v60  ;;  %v1345_v60 = vsub.f32 %v2467_v63, %v2823_v54 }
  0x9b   :  { %1972 = vmatprep.mubr.msk.f32.mxu0 %vm48_vm9, %v2116_v57  ;;  %v1337_v38 = vand.u32 4294901760, %v1336_v62 }
  0x9c   :  { %1945 = vmatmul.mubr.msk.f32.vlgmr.msra.gmra.mrb[0].mxu1 %vm33_vm0, %v2116_v57  ;;  %v1331_v29 = vand.u32 4294901760, %v1330_v4  ;;  %v1346_v44 = vand.u32 4294901760, %v1345_v60 }
  0x9d   :  { %306 = vmatpush1.xpose.msra.mxu1 %v2192_v20  ;;  %1946 = vmatprep.mubr.msk.f32.mxu1 %vm2810_vm8, %v2116_v57  ;;  %vm50_vm8 = vcmp.eq.s32.totalorder %v2368_v52, %v2213_v27 }
  0x9e   :  { %1973 = vmatmul.mubr.msk.f32.gmra.mrb[4].mxu0 %vm2826_vm7, %v2116_v57  ;;  %398 = vmatprep.subr.mxu1 %v2167_v9  ;;  %v1943_v10 = vsel %vm50_vm8, 1.0, %v2817_v31 }
  0x9f   :  { %1974 = vmatprep.mubr.msk.f32.mxu0 %vm2811_vm2, %v2116_v57  ;;  %vm49_vm2 = vcmp.eq.s32.totalorder %v2378_v59, %v2213_v27  ;;  %v2501_v49 = vsub.f32 %v1943_v10, %v1943_v10  ;;  %v1350_v10 = vand.u32 4294901760, %v2494_v34 }
  0xa0   :  { %1947 = vmatmul.mubr.msk.f32.gmra.mrb[2].mxu1 %vm39_vm10, %v2116_v57  ;;  %v1942_v40 = vsel %vm49_vm2, 1.0, %v2817_v31 }
  0xa1   :  { %1948 = vmatprep.mubr.msk.f32.mxu1 %vm46_vm6, %v2116_v57  ;;  %v2523_v31 = vsub.f32 %v1942_v40, %v1942_v40  ;;  %v1351_v4 = vsub.f32 %v2494_v34, %v1350_v10 }
  0xa2   :  { %1975 = vmatmul.mubr.msk.f32.vlgmr.msra.gmra.mrb[0].mxu0 %vm35_vm1, %v2116_v57 }
  0xa3   :  { %1976 = vmatprep.mubr.msk.f32.mxu0 %vm42_vm5, %v2116_v57  ;;  %1264 = vmatpush1.xpose.msra.mxu0 %v2432_v32  ;;  %v1365_v54 = vand.u32 4294901760, %v2523_v31  ;;  %v1352_v12 = vand.u32 4294901760, %v1351_v4  ;;  %v2117_v4 = vmov 1  }
  0xa4   :  { %1949 = vmatmul.mubr.msk.f32.gmra.mrb[4].mxu1 %vm45_vm11, %v2116_v57  ;;  %1378 = vmatprep.subr.mxu0 %v1377_v53  ;;  %v1382_v53 = vsub.f32 %v2454_v43, %v2821_v16  ;;  %v1359_v16 = vand.u32 4294901760, %v2501_v49 }
  0xa5   :  { %371 = vmatprep.mubr.f32.mxu1 %v2266_v41  ;;  %v2832_v41 = vand.u32 4294901760, %v2251_v35  ;;  %2112 = vset.pattern.permute.xlu1 %v2117_v4 }
  0xa6   :  { %1977 = vmatmul.mubr.msk.f32.gmra.mrb[2].mxu0 %vm41_vm4, %v2116_v57  ;;  %v1383_v40 = vand.u32 4294901760, %v1382_v53  ;;  %v1360_v61 = vsub.f32 %v2501_v49, %v1359_v16  ;;  %2113 = vset.pattern.permute.xlu0 %v2117_v4 }
  0xa7   :  { %1978 = vmatprep.mubr.msk.f32.mxu0 %vm48_vm9, %v2116_v57 }
  0xa8   :  { %374 = vmatmul.mubr.f32.vlgmr.msra.gmra.mrb[0].mxu1 %v2263_v39 }
  0xa9   :  { %400 = vmatpush1.xpose.msra.mxu1 %v2173_v11  ;;  %380 = vmatprep.mubr.f32.mxu1 %v2286_v50 }
  0xaa   :  { %1979 = vmatmul.mubr.msk.f32.gmra.mrb[4].mxu0 %vm2826_vm7, %v2116_v57  ;;  %500 = vmatprep.subr.mxu1 %v207_v14  ;;  %v1366_v14 = vsub.f32 %v2523_v31, %v1365_v54  ;;  %vm2827_vm7 = vcmp.eq.s32.totalorder %v2204_v25, %v2221_v30  ;;  %v2836_v25 = vand.u32 4294901760, %v2268_v42 }
  0xab   :  { %1332 = vmatprep.mubr.f32.mxu0 %v1331_v29  ;;  %v1361_v29 = vand.u32 4294901760, %v1360_v61  ;;  %v2838_v61 = vand.u32 4294901760, %v2306_v56 }
  0xac   :  { %383 = vmatmul.mubr.f32.gmra.mrb[2].mxu1 %v2328_v0  ;;  %v2835_v0 = vand.u32 4294901760, %v2454_v43 }
  0xad   :  { %389 = vmatprep.mubr.f32.mxu1 %v2334_v8  ;;  %v761_v8 = vsub.f32 %v2268_v42, %v2836_v25  ;;  %v14_v25 = vcvt.s32.f32 %v2137_v1 }
  0xae   :  { %1338 = vmatmul.mubr.f32.vlgmr.msra.gmra.mrb[0].mxu0 %v1337_v38 }
  0xaf   :  { %1347 = vmatprep.mubr.f32.mxu0 %v1346_v44  ;;  %1384 = vmatpush1.xpose.msra.mxu0 %v1383_v40  ;;  %v1367_v44 = vand.u32 4294901760, %v1366_v14 }
  0xb0   :  { %392 = vmatmul.mubr.f32.gmra.mrb[4].mxu1 %v2343_v18  ;;  %1471 = vmatprep.subr.mxu0 %v2375_v58 }
  0xb1   :  { %466 = vmatprep.mubr.f32.mxu1 %v161_v48  ;;  %v2833_v48 = vand.u32 4294901760, %v2456_v47 }
  0xb2   :  { %1353 = vmatmul.mubr.f32.gmra.mrb[2].mxu0 %v1352_v12 }
  0xb3   :  { %1362 = vmatprep.mubr.f32.mxu0 %v1361_v29 }
  0xb4   :  { %470 = vmatmul.mubr.f32.vlgmr.msra.gmra.mrb[0].mxu1 %v167_v45  ;;  %v752_v45 = vsub.f32 %v2251_v35, %v2832_v41 }
  0xb5   :  { %504 = vmatpush1.xpose.msra.mxu1 %v213_v23  ;;  %477 = vmatprep.mubr.f32.mxu1 %v176_v55  ;;  %v2830_v23 = vand.u32 4294901760, %v2434_v33  ;;  %v2834_v55 = vand.u32 4294901760, %v2467_v63 }
  0xb6   :  { %1368 = vmatmul.mubr.f32.gmra.mrb[4].mxu0 %v1367_v44  ;;  %590 = vmatprep.subr.mxu1 %v2167_v9  ;;  %v792_v9 = vsub.f32 %v2180_v13, %v791_v15  ;;  %v2829_v15 = vand.u32 4294901760, %v2253_v36  ;;  %v753_v18 = vand.u32 4294901760, %v752_v45 }
  0xb7   :  { %1980 = vmatprep.mubr.msk.f32.mxu0 %vm38_vm12, %v2116_v57 }
  0xb8   :  { %481 = vmatmul.mubr.f32.gmra.mrb[2].mxu1 %v182_v17  ;;  %v746_v20 = vsub.f32 %v2253_v36, %v2829_v15 }
  0xb9   :  { %488 = vmatprep.mubr.f32.mxu1 %v191_v28  ;;  %v2837_v28 = vand.u32 4294901760, %v2276_v46 }
  0xba   :  { %1981 = vmatmul.mubr.msk.f32.vlgmr.msra.gmra.mrb[0].mxu0 %vm37_vm13, %v2116_v57  ;;  %v747_v50 = vand.u32 4294901760, %v746_v20 }
  0xbb   :  { %1982 = vmatprep.mubr.msk.f32.mxu0 %vm44_vm14, %v2116_v57  ;;  %1474 = vmatpush1.xpose.msra.mxu0 %v2454_v43 }
  0xbc   :  { %492 = vmatmul.mubr.f32.gmra.mrb[4].mxu1 %v197_v37  ;;  %1566 = vmatprep.subr.mxu0 %v2365_v51  ;;  %v767_v37 = vsub.f32 %v2276_v46, %v2837_v28 }
  0xbd   :  { %1950 = vmatprep.mubr.msk.f32.mxu1 %vm34_vm3, %v2116_v57 }
  0xbe   :  { %1983 = vmatmul.mubr.msk.f32.gmra.mrb[2].mxu0 %vm43_vm15, %v2116_v57 }
  0xbf   :  { %1984 = vmatprep.mubr.msk.f32.mxu0 %vm50_vm8, %v2116_v57 }
  0xc0   :  { %1951 = vmatmul.mubr.msk.f32.vlgmr.msra.gmra.mrb[0].mxu1 %vm33_vm0, %v2116_v57 }
  0xc1   :  { %592 = vmatpush1.xpose.msra.mxu1 %v2173_v11  ;;  %1952 = vmatprep.mubr.msk.f32.mxu1 %vm2827_vm7, %v2116_v57  ;;  %v793_v11 = vand.u32 4294901760, %v792_v9 }
  0xc2   :  { %1985 = vmatmul.mubr.msk.f32.gmra.mrb[4].mxu0 %vm49_vm2, %v2116_v57  ;;  %678 = vmatprep.subr.mxu1 %v2157_v6  ;;  %v2828_v6 = vand.u32 4294901760, %v2375_v58  ;;  %v762_v58 = vand.u32 4294901760, %v761_v8  ;;  %v15_v8 = vcvt.s32.f32 %v2149_v3 }
  0xc3   :  { %1539 = vmatprep.mubr.f32.mxu0 %v2434_v33  ;;  %v776_v33 = vsub.f32 %v2306_v56, %v2838_v61 }
  0xc4   :  { %1953 = vmatmul.mubr.msk.f32.gmra.mrb[2].mxu1 %vm39_vm10, %v2116_v57 }
  0xc5   :  { %1954 = vmatprep.mubr.msk.f32.mxu1 %vm46_vm6, %v2116_v57 }
  0xc6   :  { %1542 = vmatmul.mubr.f32.vlgmr.msra.gmra.mrb[0].mxu0 %v2456_v47  ;;  %v777_v47 = vand.u32 4294901760, %v776_v33 }
  0xc7   :  { %1548 = vmatprep.mubr.f32.mxu0 %v2467_v63  ;;  %1568 = vmatpush1.xpose.msra.mxu0 %v2432_v32 }
  0xc8   :  { %1955 = vmatmul.mubr.msk.f32.gmra.mrb[4].mxu1 %vm45_vm11, %v2116_v57  ;;  %1668 = vmatprep.subr.mxu0 %v2828_v6 }
  0xc9   :  { %1956 = vmatprep.mubr.msk.f32.mxu1 %vm34_vm3, %v2116_v57  ;;  %vm1866_vm3 = vcmp.eq.s32.totalorder %v2189_v19, 1 }
  0xca   :  { %1551 = vmatmul.mubr.f32.gmra.mrb[2].mxu0 %v2494_v34  ;;  %v2839_v34 = vand.u32 4294901760, %v2332_v5 }
  0xcb   :  { %1557 = vmatprep.mubr.f32.mxu0 %v2501_v49 }
  0xcc   :  { %1957 = vmatmul.mubr.msk.f32.vlgmr.msra.gmra.mrb[0].mxu1 %vm33_vm0, %v2116_v57  ;;  %v782_v43 = vsub.f32 %v2332_v5, %v2839_v34  ;;  %vm2840_vm0 = vcmp.eq.s32.totalorder %v2207_v26, %v2201_v24 }
  0xcd   :  { %680 = vmatpush1.xpose.msra.mxu1 %v2159_v7  ;;  %1958 = vmatprep.mubr.msk.f32.mxu1 %vm2827_vm7, %v2116_v57  ;;  %v2831_v7 = vand.u32 4294901760, %v2198_v22 }
  0xce   :  { %1560 = vmatmul.mubr.f32.gmra.mrb[4].mxu0 %v2523_v31  ;;  %794 = vmatprep.subr.mxu1 %v793_v11  ;;  %v783_v49 = vand.u32 4294901760, %v782_v43 }
  0xcf   :  { %1634 = vmatprep.mubr.f32.mxu0 %v2830_v23  ;;  %v798_v39 = vsub.f32 %v2198_v22, %v2831_v7 }
  0xd0   :  { %1959 = vmatmul.mubr.msk.f32.gmra.mrb[2].mxu1 %vm39_vm10, %v2116_v57  ;;  %vm1899_vm10 = vcmp.eq.s32.totalorder %v2189_v19, 6 }
  0xd1   :  { %1960 = vmatprep.mubr.msk.f32.mxu1 %vm46_vm6, %v2116_v57  ;;  %v799_v17 = vand.u32 4294901760, %v798_v39  ;;  %v2844_v39 = vmov 0.0  }
  0xd2   :  { %1638 = vmatmul.mubr.f32.vlgmr.msra.gmra.mrb[0].mxu0 %v2833_v48 }
  0xd3   :  { %1645 = vmatprep.mubr.f32.mxu0 %v2834_v55  ;;  %1672 = vmatpush1.xpose.msra.mxu0 %v2835_v0 }
  0xd4   :  { %1961 = vmatmul.mubr.msk.f32.gmra.mrb[4].mxu1 %vm45_vm11, %v2116_v57  ;;  %1758 = vmatprep.subr.mxu0 %v2365_v51  ;;  %v768_v51 = vand.u32 4294901760, %v767_v37  ;;  %v16_v37 = vcvt.s32.f32 %v2142_v2  ;;  %vm1918_vm11 = vcmask 64512  }
  0xd5   :  { %748 = vmatprep.mubr.f32.mxu1 %v747_v50 }
  0xd6   :  { %1649 = vmatmul.mubr.f32.gmra.mrb[2].mxu0 %v1350_v10 }
  0xd7   :  { %1656 = vmatprep.mubr.f32.mxu0 %v1359_v16 }
  0xd8   :  { %754 = vmatmul.mubr.f32.vlgmr.msra.gmra.mrb[0].mxu1 %v753_v18 }
  0xd9   :  { %800 = vmatpush1.xpose.msra.mxu1 %v799_v17  ;;  %763 = vmatprep.mubr.f32.mxu1 %v762_v58 }
  0xda   :  { %1660 = vmatmul.mubr.f32.gmra.mrb[4].mxu0 %v1365_v54  ;;  %887 = vmatprep.subr.mxu1 %v2180_v13 }
  0xdb   :  { %1986 = vmatprep.mubr.msk.f32.mxu0 %vm38_vm12, %v2116_v57 }
  0xdc   :  { %769 = vmatmul.mubr.f32.gmra.mrb[2].mxu1 %v768_v51 }
  0xdd   :  { %778 = vmatprep.mubr.f32.mxu1 %v777_v47 }
  0xde   :  { %1987 = vmatmul.mubr.msk.f32.vlgmr.msra.gmra.mrb[0].mxu0 %vm37_vm13, %v2116_v57 }
  0xdf   :  { %1988 = vmatprep.mubr.msk.f32.mxu0 %vm44_vm14, %v2116_v57  ;;  %1760 = vmatpush1.xpose.msra.mxu0 %v2432_v32 }
  0xe0   :  { %784 = vmatmul.mubr.f32.gmra.mrb[4].mxu1 %v783_v49 }
  0xe1   :  { %1962 = vmatprep.mubr.msk.f32.mxu1 %vm2840_vm0, %v2116_v57 }
  0xe2   :  { %1989 = vmatmul.mubr.msk.f32.gmra.mrb[2].mxu0 %vm43_vm15, %v2116_v57 }
  0xe3   :  { %1990 = vmatprep.mubr.msk.f32.mxu0 %vm50_vm8, %v2116_v57 }
  0xe4   :  { %1963 = vmatmul.mubr.msk.f32.vlgmr.msra.gmra.mrb[0].mxu1 %vm35_vm1, %v2116_v57  ;;  %vm2841_vm1 = vcmp.eq.s32.totalorder %v2195_v21, %v2213_v27 }
  0xe5   :  { %890 = vmatpush1.xpose.msra.mxu1 %v2198_v22  ;;  %1964 = vmatprep.mubr.msk.f32.mxu1 %vm42_vm5, %v2116_v57  ;;  %vm1865_vm5 = vcmp.eq.s32.totalorder %v2189_v19, 0 }
  0xe6   :  { %1991 = vmatmul.mubr.msk.f32.gmra.mrb[4].mxu0 %vm49_vm2, %v2116_v57 }
  0xe7   :  { %1992 = vmatprep.mubr.msk.f32.mxu0 %vm38_vm12, %v2116_v57 }
  0xe8   :  { %1965 = vmatmul.mubr.msk.f32.gmra.mrb[2].mxu1 %vm41_vm4, %v2116_v57 }
  0xe9   :  { %1966 = vmatprep.mubr.msk.f32.mxu1 %vm48_vm9, %v2116_v57 }
  0xea   :  { %1993 = vmatmul.mubr.msk.f32.vlgmr.msra.gmra.mrb[0].mxu0 %vm37_vm13, %v2116_v57 }
  0xeb   :  { %1994 = vmatprep.mubr.msk.f32.mxu0 %vm44_vm14, %v2116_v57 }
  0xec   :  { %1967 = vmatmul.mubr.msk.f32.gmra.mrb[4].mxu1 %vm2841_vm1, %v2116_v57 }
  0xed   :  { %955 = vmatprep.mubr.f32.mxu1 %v2253_v36 }
  0xee   :  { %1995 = vmatmul.mubr.msk.f32.gmra.mrb[2].mxu0 %vm43_vm15, %v2116_v57 }
  0xef   :  { %1996 = vmatprep.mubr.msk.f32.mxu0 %vm50_vm8, %v2116_v57 }
  0xf0   :  { %958 = vmatmul.mubr.f32.vlgmr.msra.gmra.mrb[0].mxu1 %v2251_v35 }
  0xf1   :  { %964 = vmatprep.mubr.f32.mxu1 %v2268_v42 }
  0xf2   :  { %1997 = vmatmul.mubr.msk.f32.gmra.mrb[4].mxu0 %vm49_vm2, %v2116_v57  ;;  %vm1867_vm2 = vcmp.eq.s32.totalorder %v2189_v19, 2 }
  0xf3   :  { %vm2774_vm4 = vmor %vm1866_vm3, %vm1867_vm2 }
  0xf4   :  { %967 = vmatmul.mubr.f32.gmra.mrb[2].mxu1 %v2276_v46 }
  0xf5   :  { %973 = vmatprep.mubr.f32.mxu1 %v2306_v56 }
  0xf8   :  { %976 = vmatmul.mubr.f32.gmra.mrb[4].mxu1 %v2332_v5 }
 0x1bd   :  { %v1827_v13 = vpop.f32.mrb[0].mxu0 }
 0x1be   :  { %v1829_v21 = vpop.f32.mrb[1].mxu0 }
 0x1c1   :  { %v1834_v22 = vpop.f32.mrb[2].mxu0 }
 0x1c2   :  { %v1836_v24 = vpop.f32.mrb[3].mxu0 }
 0x1c3   :  { %v959_v26 = vpop.f32.mrb[0].mxu1 }
 0x1c4   :  { %v2001_v30 = vadd.f32 %v1827_v13, %v959_v26  ;;  %v961_v31 = vpop.f32.mrb[1].mxu1 }
 0x1c5   :  { %v1841_v35 = vpop.f32.mrb[4].mxu0 }
 0x1c6   :  { %v1845_v36 = vmin.f32 %v2001_v30, 180.0  ;;  %v1855_v42 = vmin.f32 %v2001_v30, 800.0  ;;  %v1843_v27 = vpop.f32.mrb[5].mxu0 }
 0x1c7   :  { %v968_v46 = vpop.f32.mrb[2].mxu1 }
 0x1c8   :  { %v1849_v54 = vmul.f32 0.0055555557, %v1845_v36  ;;  %v1859_v56 = vmul.f32 0.00125, %v1855_v42  ;;  %v2002_v52 = vadd.f32 %v1834_v22, %v968_v46  ;;  %v970_v5 = vpop.f32.mrb[3].mxu1 }
 0x1ca   :  { %v1852_v59 = vsub.f32 1.0, %v1849_v54  ;;  %v1862_v32 = vsub.f32 1.0, %v1859_v56  ;;  %v1846_v60 = vmin.f32 %v2002_v52, 180.0  ;;  %v1856_v63 = vmin.f32 %v2002_v52, 800.0 }
 0x1cb   :  { %v977_v16 = vpop.f32.mrb[4].mxu1 }
 0x1cc   :  { %v1869_v38 = vsel %vm2774_vm4, %v1862_v32, %v2001_v30  ;;  %v1850_v53 = vmul.f32 0.0055555557, %v1846_v60  ;;  %v1860_v62 = vmul.f32 0.00125, %v1856_v63  ;;  %v2003_v10 = vadd.f32 %v1841_v35, %v977_v16  ;;  %v979_v40 = vpop.f32.mrb[5].mxu1 }
 0x1cd   :  { %v1872_v12 = vsel %vm1865_vm5, %v1852_v59, %v1869_v38 }
 0x1ce   :  { %v1853_v14 = vsub.f32 1.0, %v1850_v53  ;;  %v1863_v29 = vsub.f32 1.0, %v1860_v62  ;;  %v1847_v44 = vmin.f32 %v2003_v10, 180.0  ;;  %v1857_v9 = vmin.f32 %v2003_v10, 800.0 }
 0x1cf   :  { %vm1875_vm6 = vcmp.ge.f32.partialorder %v1872_v12, 0.99 }
 0x1d0   :  { %v1870_v6 = vsel %vm2774_vm4, %v1863_v29, %v2002_v52  ;;  %v1851_v11 = vmul.f32 0.0055555557, %v1847_v44  ;;  %v1861_v15 = vmul.f32 0.00125, %v1857_v9  ;;  %v1998_v41 = vsel %vm1875_vm6, 1.0, %v2844_v39 }
 0x1d1   :  { %v1873_v20 = vsel %vm1865_vm5, %v1853_v14, %v1870_v6 }
 0x1d2   :  { %v1854_v23 = vsub.f32 1.0, %v1851_v11  ;;  %v1864_v7 = vsub.f32 1.0, %v1861_v15  ;;  %vm1876_vm8 = vcmp.ge.f32.partialorder %v1873_v20, 0.99 }
 0x1d3   :  { %v1999_v45 = vsel %vm1876_vm8, 1.0, %v2844_v39 }
 0x1d4   :  { %v1871_v48 = vsel %vm2774_vm4, %v1864_v7, %v2003_v10  ;;  %v2107_v50 = vpack.i.bf16 %v1999_v45, %v1998_v41 }
 0x1d5   :  { %v1874_v55 = vsel %vm1865_vm5, %v1854_v23, %v1871_v48 }
 0x1d6   :  { %2108 = vrot.lane.b32.xlu1 %v2107_v50, %s2118_s0  ;;  %vm1877_vm9 = vcmp.ge.f32.partialorder %v1874_v55, 0.99 }
 0x1d7   :  { %v2000_v0 = vsel %vm1877_vm9, 1.0, %v2844_v39 }
 0x1d8   :  { %1891 = vrot.lane.b32.xlu0 %v2000_v0, %s2118_s0 }
 0x248   :  { %v2109_v17 = vpop.permute.xlu1 %2108 }
 0x249   :  { %v2111_v18 = vunpack.i.h.bf16 %v2109_v17  ;;  %v2110_v28 = vunpack.i.l.bf16 %v2109_v17 }
 0x24a   :  { %v1892_v33 = vpop.permute.xlu0 %1891 }
 0x24b   :  { %v1897_v58 = vmul.f32 %v2111_v18, %v15_v8  ;;  %v1896_v61 = vmul.f32 %v2110_v28, %v14_v25  ;;  %v1898_v51 = vmul.f32 %v1892_v33, %v16_v37 }
 0x24d   :  { %1902 = vperm.xlu1 %2112, %v1896_v61   ;;  %1907 = vperm.xlu0 %2113, %v1897_v58  }
 0x251   :  { %1912 = vperm.xlu1 %2112, %v1898_v51  }
 0x2cc   :  { %v1903_v34 = vpop.permute.xlu1 %1902  ;;  %v1908_v43 = vpop.permute.xlu0 %1907 }
 0x2cd   :  { %v1915_v1 = vsel %vm1899_vm10, %v1903_v34, %v1872_v12  ;;  %v1916_v47 = vsel %vm1899_vm10, %v1908_v43, %v1873_v20 }
 0x2ce   :  { %1919 = vst.msk [vmem:[%s2809_s2] sm:$0xff] %vm1918_vm11, %v1915_v1  ;;  %1920 = vst.msk [vmem:[%s2809_s2 + $0x8] sm:$0xff] %vm1918_vm11, %v1916_v47 }
 0x2d0   :  { %v1913_v2 = vpop.permute.xlu1 %1912 }
 0x2d1   :  { %v1917_v3 = vsel %vm1899_vm10, %v1913_v2, %v1874_v55 }
 0x2d2   :  { %1921 = vst.msk [vmem:[%s2809_s2 + $0x10] sm:$0xff] %vm1918_vm11, %v1917_v3 }

</bundles_post_ra>
